<compile_context>
chip_gen: v6e
topology: v6e:2x2x1
jax: 0.10.0
libtpu: 0.0.40
codegen_flags: <defaults>
</compile_context>

<pallas_src>
import functools

import jax
import jax.numpy as jnp
from jax.experimental import pallas as pl
from jax.experimental.pallas import tpu as pltpu

_LANES = 128
_TARGET_TILE_ROWS = 2048   # f32: 1 MiB per input buffer, 2 MiB double-buffered
_NUM_SHARDS = 2            # "parallel" axis -> both TCs on v7x; harmless on v5e/v6e


def _round_up(a, b):
    return ((a + b - 1) // b) * b


def _gan_loss_kernel(x_ref, acc_ref, *, mode, target_val, n_valid,
                     tile_rows, tiles_per_shard, mask_needed):
    """Per-shard partial sum of the elementwise GAN loss into a (1,8,128) block."""
    t = pl.program_id(1)

    @pl.when(t == 0)
    def _():
        acc_ref[...] = jnp.zeros_like(acc_ref)

    # Native-dtype load, in-register upcast.
    x = x_ref[...].astype(jnp.float32)

    if mode == "bce":
        tv = float(target_val)
        if tv == 1.0:
            # softplus(-x) == max(x,0) - x + log1p(exp(-|x|))
            elem = jnp.maximum(-x, 0.0) + jnp.log1p(jnp.exp(-jnp.abs(x)))
        elif tv == 0.0:
            # softplus(x)
            elem = jnp.maximum(x, 0.0) + jnp.log1p(jnp.exp(-jnp.abs(x)))
        else:
            # general numerically-stable BCE-with-logits
            elem = (jnp.maximum(x, 0.0) - x * jnp.float32(tv)
                    + jnp.log1p(jnp.exp(-jnp.abs(x))))
    elif mode == "mse":
        d = x - jnp.float32(target_val)
        elem = d * d
    elif mode == "wgan":
        elem = x  # sign folded into the wrapper scalar glue
    else:
        raise NotImplementedError(mode)

    if mask_needed:
        # Zero the contribution of padded elements (static-gated: only emitted
        # when the wrapper actually padded the input).
        s = pl.program_id(0)
        row0 = (s * tiles_per_shard + t) * tile_rows
        row_ids = jax.lax.broadcasted_iota(jnp.int32, (tile_rows, _LANES), 0) + row0
        lane_ids = jax.lax.broadcasted_iota(jnp.int32, (tile_rows, _LANES), 1)
        flat_idx = row_ids * _LANES + lane_ids
        elem = jnp.where(flat_idx < n_valid, elem, 0.0)

    # Fold the tile into a single vreg (pure VPU adds) and accumulate.
    partial = elem.reshape(tile_rows // 8, 8, _LANES).sum(axis=0)
    acc_ref[...] += partial[None, :, :]


def gan_loss(x, target_is_real, gan_type="gan",
             real_label_val=1.0, fake_label_val=0.0):
    """Pallas equivalent of GANLoss(gan_type, ...)(x, target_is_real)."""
    gan_type = gan_type.lower()
    if gan_type in ("gan", "ragan"):
        mode = "bce"
    elif gan_type == "lsgan":
        mode = "mse"
    elif gan_type == "wgan-gp":
        mode = "wgan"
    else:
        raise NotImplementedError(f"GAN type [{gan_type}] is not found")

    target_val = real_label_val if target_is_real else fake_label_val

    n = int(x.size)
    itemsize = jnp.dtype(x.dtype).itemsize
    # Sublane packing: f32 -> 8-row multiples, bf16 -> 16, 8-bit -> 32.
    min_rows = 8 * max(1, 4 // itemsize)

    m = -(-n // _LANES)                                   # rows of 128 lanes
    rows_per_shard = max(1, -(-m // _NUM_SHARDS))
    tile_rows = min(_TARGET_TILE_ROWS, _round_up(rows_per_shard, min_rows))
    tiles_per_shard = -(-rows_per_shard // tile_rows)
    padded_rows = _NUM_SHARDS * tiles_per_shard * tile_rows
    padded_n = padded_rows * _LANES
    mask_needed = padded_n != n

    if mask_needed:
        x_flat = jnp.pad(x.reshape(-1), (0, padded_n - n))
    else:
        x_flat = x.reshape(-1)
    x2 = x_flat.reshape(padded_rows, _LANES)              # native dtype slab

    kernel = functools.partial(
        _gan_loss_kernel,
        mode=mode,
        target_val=float(target_val),
        n_valid=n,
        tile_rows=tile_rows,
        tiles_per_shard=tiles_per_shard,
        mask_needed=mask_needed,
    )

    partials = pl.pallas_call(
        kernel,
        out_shape=jax.ShapeDtypeStruct((_NUM_SHARDS, 8, _LANES), jnp.float32),
        grid_spec=pltpu.PrefetchScalarGridSpec(
            num_scalar_prefetch=0,
            grid=(_NUM_SHARDS, tiles_per_shard),
            in_specs=[pl.BlockSpec(
                (tile_rows, _LANES),
                lambda s, t: (s * tiles_per_shard + t, 0))],
            out_specs=pl.BlockSpec((1, 8, _LANES), lambda s, t: (s, 0, 0)),
        ),
        compiler_params=pltpu.CompilerParams(
            dimension_semantics=("parallel", "arbitrary")),
    )(x2)

    # Final cross-lane reduce + scalar glue ("mean", WGAN sign).
    total = jnp.sum(partials)
    if mode == "wgan":
        total = -total if target_is_real else total
    return total / jnp.float32(n)


def _reference(x, target_is_real, gan_type, real_label_val=1.0, fake_label_val=0.0):
    """Pure-JAX reference mirroring the PyTorch module."""
    x = x.astype(jnp.float32)
    gan_type = gan_type.lower()
    if gan_type == "wgan-gp":
        return -jnp.mean(x) if target_is_real else jnp.mean(x)
    t = jnp.full_like(x, real_label_val if target_is_real else fake_label_val)
    if gan_type in ("gan", "ragan"):
        elem = jnp.maximum(x, 0.0) - x * t + jnp.log1p(jnp.exp(-jnp.abs(x)))
        return jnp.mean(elem)
    elif gan_type == "lsgan":
        return jnp.mean((x - t) ** 2)
    raise NotImplementedError(gan_type)


if __name__ == "__main__":
    key = jax.random.PRNGKey(0)
    k1, k2 = jax.random.split(key)

    # Discriminator output map, NCHW (aligned shape — no padding path).
    x_main = jax.random.normal(k1, (2, 4, 16, 16), dtype=jnp.float32)
    # Awkward shape (exercises the padding + in-kernel mask path).
    x_odd = jax.random.normal(k2, (2, 3, 15, 17), dtype=jnp.float32)

    ok = True
    for x in (x_main, x_odd):
        for gan_type in ("gan", "lsgan", "wgan-gp"):
            for target_is_real in (True, False):
                out = gan_loss(x, target_is_real, gan_type=gan_type)
                out = jax.block_until_ready(out)
                ref = _reference(x, target_is_real, gan_type)
                if not jnp.allclose(out, ref, atol=1e-5, rtol=1e-5):
                    ok = False
                    print(f"MISMATCH shape={x.shape} {gan_type} "
                          f"real={target_is_real}: {out} vs {ref}")

    if ok:
        print("KERNEL_OK")
</pallas_src>

<mosaic_0001>
module attributes {stable_mosaic.version = 11 : i64} {
  func.func @_gan_loss_kernel(%arg0: i32, %arg1: i32, %arg2: memref<8x128xf32, #tpu.memory_space<vmem>>, %arg3: memref<1x8x128xf32, #tpu.memory_space<vmem>>) attributes {dimension_semantics = [#tpu.dimension_semantics<parallel>, #tpu.dimension_semantics<arbitrary>], iteration_bounds = array<i64: 2, 1>, scalar_prefetch = 0 : i64, scratch_operands = 0 : i64, tpu.core_type = #tpu.core_type<tc>, window_params = [{transform_indices = @transform_0, window_bounds = array<i64: 8, 128>}, {transform_indices = @transform_1, window_bounds = array<i64: 1, 8, 128>}]} {
    %c0_i32 = arith.constant 0 : i32
    %0 = arith.cmpi eq, %arg1, %c0_i32 : i32
    %1 = arith.extui %0 : i1 to i32
    %c0_i32_0 = arith.constant 0 : i32
    %2 = arith.cmpi ne, %1, %c0_i32_0 : i32
    scf.if %2 {
      %cst_11 = arith.constant 0.000000e+00 : f32
      %20 = vector.broadcast %cst_11 : f32 to vector<1x8x128xf32>
      %c0_12 = arith.constant 0 : index
      %c0_13 = arith.constant 0 : index
      %c0_14 = arith.constant 0 : index
      %21 = vector.load %arg3[%c0_12, %c0_13, %c0_14] : memref<1x8x128xf32, #tpu.memory_space<vmem>>, vector<1x8x128xf32>
      tpu.vector_store %arg3[%c0_12, %c0_13, %c0_14], %20 {strides = array<i32>} : memref<1x8x128xf32, #tpu.memory_space<vmem>>, vector<1x8x128xf32>,
    } else {
    }
    %c0 = arith.constant 0 : index
    %c0_1 = arith.constant 0 : index
    %3 = vector.load %arg2[%c0, %c0_1] : memref<8x128xf32, #tpu.memory_space<vmem>>, vector<8x128xf32>
    %cst = arith.constant 0.000000e+00 : f32
    %4 = vector.broadcast %cst : f32 to vector<8x128xf32>
    %5 = arith.subf %4, %3 : vector<8x128xf32>
    %cst_2 = arith.constant 0.000000e+00 : f32
    %6 = vector.broadcast %cst_2 : f32 to vector<8x128xf32>
    %7 = arith.maximumf %5, %6 : vector<8x128xf32>
    %8 = math.absf %3 : vector<8x128xf32>
    %cst_3 = arith.constant 0.000000e+00 : f32
    %9 = vector.broadcast %cst_3 : f32 to vector<8x128xf32>
    %10 = arith.subf %9, %8 : vector<8x128xf32>
    %11 = math.exp %10 : vector<8x128xf32>
    %12 = math.log1p %11 : vector<8x128xf32>
    %13 = arith.addf %7, %12 : vector<8x128xf32>
    %14 = vector.shape_cast %13 : vector<8x128xf32> to vector<1x8x128xf32>
    %cst_4 = arith.constant dense<0.000000e+00> : vector<8x128xf32>
    %15 = vector.multi_reduction <add>, %14, %cst_4 [0] : vector<1x8x128xf32> to vector<8x128xf32>
    %c0_5 = arith.constant 0 : index
    %c0_6 = arith.constant 0 : index
    %c0_7 = arith.constant 0 : index
    %16 = vector.load %arg3[%c0_5, %c0_6, %c0_7] : memref<1x8x128xf32, #tpu.memory_space<vmem>>, vector<1x8x128xf32>
    %17 = vector.shape_cast %15 : vector<8x128xf32> to vector<1x8x128xf32>
    %18 = arith.addf %16, %17 : vector<1x8x128xf32>
    %c0_8 = arith.constant 0 : index
    %c0_9 = arith.constant 0 : index
    %c0_10 = arith.constant 0 : index
    %19 = vector.load %arg3[%c0_8, %c0_9, %c0_10] : memref<1x8x128xf32, #tpu.memory_space<vmem>>, vector<1x8x128xf32>
    tpu.vector_store %arg3[%c0_8, %c0_9, %c0_10], %18 {strides = array<i32>} : memref<1x8x128xf32, #tpu.memory_space<vmem>>, vector<1x8x128xf32>,
    return
  }
  func.func @transform_0(%arg0: i32, %arg1: i32) -> (i32, i32) {
    %c1_i32 = arith.constant 1 : i32
    %0 = arith.muli %arg0, %c1_i32 : i32
    %1 = arith.addi %0, %arg1 : i32
    %c0_i32 = arith.constant 0 : i32
    %c0_i32_0 = arith.constant 0 : i32
    return %1, %c0_i32 : i32, i32
  }
  func.func @transform_1(%arg0: i32, %arg1: i32) -> (i32, i32, i32) {
    %c0_i32 = arith.constant 0 : i32
    %c0_i32_0 = arith.constant 0 : i32
    %c0_i32_1 = arith.constant 0 : i32
    return %arg0, %c0_i32, %c0_i32_0 : i32, i32, i32
  }
}

</mosaic_0001>

<bundles_post_ra>
// kernel: tpu_custom_call.1
= control target key start
LH: loop header
LB: loop body
LE: loop exit
PB: predicated region body
PF: predicated region fallthrough
CT: control target
= control target key end

     0   :  { %6 = vsyncpa [#allocation3], 0  ;;  %s603_s0 = inlined_call_operand.hbm [shape: f32[16,128], index: 0, kind: input, shape index: {}]   ;;  %s604_s1 = inlined_call_operand.hbm [shape: f32[2,8,128], index: 1, kind: output, shape index: {}]  }
   0x1   :  { %8 = vsyncpa [#allocation3 + $0x1], 0 }
   0x2   :  { %9 = vsyncpa [#allocation4], 0 }
   0x3   :  { %11 = vsyncpa [#allocation4 + $0x1], 0  ;;  %s469_s6 = smov 0   ;;  %s471_s7 = smov 0  }
   0x4   :  { %s473_s8 = smov 0   ;;  %s475_s9 = smov 0  }
   0x5   :  { %s477_s10 = smov 0   ;;  %s479_s11 = smov 0  }
   0x6 LB: > { %s267_s12 = sadd.s32 4294967295, %s455_s11   ;;  %s268_s13 = sadd.s32 4294967294, %s455_s11   ;;  %s455_s11 = sphi %s479_s11, %s17_s11   ;;  %s451_s10 = sphi %s477_s10, %s616_s10   ;;  %s447_s9 = sphi %s475_s9, %s615_s9   ;;  %s443_s8 = sphi %s473_s8, %s614_s8   ;;  %s439_s7 = sphi %s471_s7, %s613_s7   ;;  %s435_s6 = sphi %s469_s6, %s612_s6  }
   0x7   : > { %s29_s14 = sadd.s32 1, %s451_s10  ;;  %s38_s15 = sadd.s32 1, %s443_s8 }
   0x8   : > { %p31_p0 = scmp.ge.s32.totalorder %s29_s14, 2  ;;  %p45_p1 = scmp.ne.s32.totalorder %s443_s8, %s439_s7 }
   0x9   : > { %p46_p2 = scmp.eq.s32.totalorder %s455_s11, 0  ;;  %p51_p3 = scmp.ne.s32.totalorder %s439_s7, %s435_s6 }
   0xa   : > { %s618_s14 = smov (%p31_p0, %s29_s14), 0  ;;  %p52_p5 = scmp.eq.s32.totalorder %s267_s12, 0 }
   0xb   : > { %p510_p4 = por %p46_p2, %p45_p1  ;;  %s35_s17 = ssub.s32 %s451_s10, %s618_s14 }
   0xc   : > { %p75_p6 = scmp.eq.s32.totalorder %s267_s12, 1  ;;  %p36_p7 = scmp.eq.s32.totalorder %s35_s17, 0 }
   0xd   : > { %p516_p8 = por %p52_p5, %p51_p3  ;;  %p81_p10 = scmp.eq.s32.totalorder %s268_s13, 1 }
   0xe   : > { %p520_p9 = por %p75_p6, %p45_p1  ;;  %p292_p13 = scmp.lt.s32.totalorder %s455_s11, 2 }
   0xf   : > { %s525_s20 = scalar_select %p36_p7, %s443_s8, %s38_s15  }
  0x10   : > { %p527_p11 = por %p81_p10, %p51_p3  ;;  %s101_s22 = sand.u32 1, %s443_s8  }
  0x11   : > { %s271_s23 = sshll.u32 %s101_s22, 3  ;;  %s272_s24 = sshll.u32 %s451_s10, 7 }
  0x12   : > { %s608_s21 = scalar_select %p527_p11, 1, 0 }
  0x13   : > { %s111_s27 = scalar_lea.hbm %s603_s0, %s272_s24  ;;  %s105_s28 = scalar_lea.vmem [#allocation2], %s271_s23 }
  0x14   : > { %s113_s29 = sshll.u32 %s105_s28, 4  ;;  %p540_p0 = pnand %p292_p13, %p510_p4  ;;  %s114_s29 = int_to_ptr.vmem [resolvable:$true] %s113_s29 }
  0x15   : > { %p273_p1 = scmp.ge.s32.totalorder %s455_s11, 1  ;;  %p118_p2 = scmp.lt.s32.totalorder %s455_s11, 3 }
  0x16   : > { %s102_s2 = scalar_lea.sflag [#allocation3], %s101_s22  ;;  %p349_p3 = pneg %p540_p0 }
  0x17   : > { %s360_s3 = scalar_lea.vmem %s114_s29, 128  ;;  %s457_s4 = smov [#allocation2]  }
  0x18   : > { %p361_p5 = scmp.ne.s32.totalorder %s114_s29, %s360_s3  ;;  %s365_s5 = sshll.u32 %s457_s4, 4  ;;  %s366_s5 = int_to_ptr.vmem [resolvable:$false] %s365_s5 }
  0x19   : > { %s367_s12 = scalar_lea.vmem %s366_s5, 256  ;;  %p368_p10 = scmp.lt.s32.totalorder %s114_s29, %s366_s5 }
  0x1a   : > { %p363_p6 = pnand %p361_p5, %p349_p3  ;;  %p369_p12 = scmp.lt.s32.totalorder %s367_s12, %s360_s3 }
  0x1c   : > { %p364_p7 = pneg %p363_p6  ;;  %p370_p4 = por %p369_p12, %p368_p10 }
  0x1e   : > { %p371_p13 = pnand %p370_p4, %p364_p7 }
  0x20   : > { %374 = shalt.err (!%p371_p13)
}
  0x21   : > { %287 = dma.hbm_to_vmem [thread:$0]  (!%p540_p0), %s111_s27, 128, %s114_s29, %s102_s2  }
  0x22   : > { %p119_p11 = pnand %p273_p1, %p118_p2 }
  0x23   : > { %s555_s13 = sand.u32 (!%p119_p11), 1, %s439_s7  }
  0x24   : > { %122 = sbr.rel (%p119_p11) target bundleno = 97 (0x61), region = 24  ;;  %s274_s15 = sshll.u32 (!%p119_p11), %s555_s13, 3 }
  0x25   : > { %s125_s16 = scalar_lea.sflag (!%p119_p11), [#allocation3], %s555_s13  ;;  %s128_s17 = scalar_lea.vmem (!%p119_p11), [#allocation2], %s274_s15 }
  0x29   : > { %426 = dma.done.wait (%p516_p8), %s125_s16, 128  }
  0x2a   : > { %428 = vsyncadd (%p516_p8), %s125_s16, 4294967168  ;;  %v153_v0 = vld [vmem:[%s128_s17] sm:$0xff]  ;;  %s277_s18 = sshll.u32 %s447_s9, 7  ;;  %s146_s22 = scalar_lea.vmem [#allocation5], %s274_s15 }
  0x2b   : > { %v156_v1 = vand.u32 2147483647, %v153_v0  ;;  %v154_v8 = vsub.f32 0.0, %v153_v0  ;;  %s188_s23 = sshll.u32 %s146_s22, 4  ;;  %s186_s26 = scalar_lea.hbm %s604_s1, %s277_s18  ;;  %s189_s23 = int_to_ptr.vmem [resolvable:$true] %s188_s23 }
  0x2c   : > { %s175_s27 = scalar_lea.sflag [#allocation4], %s555_s13  ;;  %s375_s28 = scalar_lea.vmem %s189_s23, 128 }
  0x2d   : > { %v157_v2 = vsub.f32 0.0, %v156_v1  ;;  %v155_v12 = vmax.f32 %v154_v8, 0.0  ;;  %p376_p8 = scmp.ne.s32.totalorder %s189_s23, %s375_s28  ;;  %s458_s29 = smov [#allocation5]  }
  0x2e   : > { %s379_s30 = sshll.u32 %s458_s29, 4  ;;  %s380_s30 = int_to_ptr.vmem [resolvable:$false] %s379_s30 }
  0x2f   : > { %v158_v3 = vmul.f32 1.442695, %v157_v2  ;;  %p377_p11 = pnand %p376_p8, %p520_p9  ;;  %s381_s2 = scalar_lea.vmem %s380_s30, 256 }
  0x30   : > { %p382_p0 = scmp.lt.s32.totalorder %s189_s23, %s380_s30  ;;  %p383_p1 = scmp.lt.s32.totalorder %s381_s2, %s375_s28 }
  0x31   : > { %343 = vpow2.f32 %v158_v3  ;;  %p378_p12 = pneg %p377_p11 }
  0x32   : > { %p384_p2 = por %p383_p1, %p382_p0 }
  0x34   : > { %p385_p3 = pnand %p384_p2, %p378_p12 }
  0x3e   : > { %v344_v4 = vpop.eup %343 }
  0x3f   : > { %v160_v5 = vadd.f32 1.0, %v344_v4  ;;  %v163_v6 = vmul.f32 -0.5, %v344_v4  ;;  %v166_v9 = vand.u32 2147483647, %v344_v4 }
  0x41   : > { %345 = vlog2.f32 %v160_v5  ;;  %v164_v7 = vadd.f32 1.0, %v163_v6  ;;  %vm167_vm0 = vcmp.lt.f32.partialorder %v166_v9, 0.0004427343 }
  0x43   : > { %v165_v10 = vmul.f32 %v344_v4, %v164_v7 }
  0x4e   : > { %v346_v11 = vpop.eup %345 }
  0x4f   : > { %v162_v13 = vmul.f32 0.6931472, %v346_v11 }
  0x51   : > { %v168_v14 = vsel %vm167_vm0, %v165_v10, %v162_v13 }
  0x52   : > { %v169_v15 = vadd.f32 %v168_v14, %v155_v12 }
  0x54   : > { %173 = vst [vmem:[%s146_s22] sm:$0xff] %v169_v15 }
  0x55   : > { %388 = shalt.err (!%p385_p3)
}
  0x56   : > { %s389_s9 = scalar_lea.hbm %s186_s26, 128  ;;  %s393_s5 = scalar_lea.hbm %s604_s1, 256 }
  0x57   : > { %p390_p5 = scmp.ne.s32.totalorder %s186_s26, %s389_s9  ;;  %p394_p10 = scmp.lt.s32.totalorder %s186_s26, %s604_s1 }
  0x58   : > { %p395_p4 = scmp.lt.s32.totalorder %s393_s5, %s389_s9 }
  0x59   : > { %p391_p6 = pnand %p390_p5, %p520_p9 }
  0x5a   : > { %p396_p13 = por %p395_p4, %p394_p10 }
  0x5b   : > { %p392_p7 = pneg %p391_p6 }
  0x5d   : > { %p397_p8 = pnand %p396_p13, %p392_p7 }
  0x5f   : > { %400 = shalt.err (!%p397_p8)
}
  0x60   : > { %282 = dma.vmem_to_hbm [thread:$0]  (%p520_p9), %s189_s23, 128, %s186_s26, %s175_s27  }
  0x61 PF: > { %s200_s15 = sand.u32 1, %s435_s6   ;;  %p610_p11 = scmp.ne.s32.totalorder %s608_s21, 0 }
  0x62   : > { %p611_p12 = scmp.ge.s32.totalorder %s455_s11, 2  ;;  %s201_s16 = scalar_lea.sflag [#allocation4], %s200_s15 }
  0x64   : > { %p289_p0 = pnand %p611_p12, %p610_p11 }
  0x66   : > { %p290_p1 = pneg %p289_p0 }
  0x68   : > { %430 = dma.done.wait (%p290_p1), %s201_s16, 128  }
  0x69   : > { %432 = vsyncadd (%p290_p1), %s201_s16, 4294967168  ;;  %s17_s11 = sadd.s32 1, %s455_s11   ;;  %s612_s6 = smov %s439_s7 }
  0x6a   : > { %p14_p2 = scmp.ge.s32.totalorder %s17_s11, 4   ;;  %s613_s7 = smov %s443_s8 }
  0x6b   : > { %s614_s8 = smov %s525_s20  ;;  %s615_s9 = smov %s451_s10 }
  0x6c   : > { %s616_s10 = smov %s618_s14  ;;  %16 = sbr.rel (!%p14_p2) target bundleno = 6 (0x6), region = 73 }
  0x71   :  { %206 = vsyncpa [#allocation3], 1 }
  0x72   :  { %208 = vsyncpa [#allocation3 + $0x1], 1 }
  0x73   :  { %209 = vsyncpa [#allocation4], 1 }
  0x74   :  { %211 = vsyncpa [#allocation4 + $0x1], 1 }

</bundles_post_ra>
